<compile_context>
chip_gen: v7x
topology: tpu7x:2x2x1
jax: 0.10.0
libtpu: 0.0.40
codegen_flags: <defaults>
</compile_context>

<pallas_src>
import math

import jax
import jax.numpy as jnp
from jax.experimental import pallas as pl
from jax.experimental.pallas import tpu as pltpu

LN_CHANNEL_EPS = 1e-5


def _round_up(v, m):
    return (v + m - 1) // m * m


def _vmem_budget():
    """(block budget, vmem limit) safe on v5e / v6e / v7x."""
    try:
        vmem_cap = int(pltpu.get_tpu_info().vmem_capacity_bytes)
    except Exception:
        vmem_cap = 64 << 20  # v7x-safe fallback
    budget = max(8 << 20, min(24 << 20, vmem_cap // 2 - (8 << 20)))
    return budget, budget + (8 << 20)


# ---------------------------------------------------------------------------
# Fused patch embedding (Conv3d, kernel == stride == patch) + LayerNormChannel
# ---------------------------------------------------------------------------
def _embed_ln_kernel(p_ref, w_ref, cb_ref, lw_ref, lb_ref, o_ref):
    # p_ref : (1, TN, K)  flattened patches      (tokens on sublanes)
    # w_ref : (K, C)      conv weight (K = Cin*pd*ph*pw)
    # cb/lw/lb : (1, C)   conv bias / LN weight / LN bias
    # o_ref : (1, TN, C)  hidden on lanes (lane-dense when C % 128 == 0)
    p = p_ref[0].astype(jnp.float32)
    w = w_ref[...].astype(jnp.float32)
    y = jnp.dot(p, w, preferred_element_type=jnp.float32)        # MXU
    y = y + cb_ref[...].astype(jnp.float32)
    u = jnp.mean(y, axis=-1, keepdims=True)                      # channel mean
    d = y - u
    s = jnp.mean(d * d, axis=-1, keepdims=True)
    yn = d * jax.lax.rsqrt(s + LN_CHANNEL_EPS)                   # EUP rsqrt
    yn = lw_ref[...].astype(jnp.float32) * yn + lb_ref[...].astype(jnp.float32)
    o_ref[0] = yn.astype(o_ref.dtype)


def embeddings_forward(x, conv_w, conv_b, ln_w, ln_b, patch_size):
    """Embeddings.forward: Conv3d(patch, stride=patch) -> LayerNormChannel.

    x: [B, Cin, D, H, W]; conv_w: [C, Cin, pd, ph, pw]; conv_b/ln_w/ln_b: [C].
    Returns [B, C, D//pd, H//ph, W//pw].
    """
    B, Cin, D, H, W = x.shape
    C = conv_w.shape[0]
    pd, ph, pw = patch_size
    Do, Ho, Wo = D // pd, H // ph, W // pw
    N = Do * Ho * Wo
    K = Cin * pd * ph * pw

    # Non-overlapping patch extraction == Conv3d VALID with stride == kernel.
    xc = x[:, :, :Do * pd, :Ho * ph, :Wo * pw]
    xp = xc.reshape(B, Cin, Do, pd, Ho, ph, Wo, pw)
    xp = xp.transpose(0, 2, 4, 6, 1, 3, 5, 7).reshape(B, N, K)
    w2 = conv_w.reshape(C, K).T                                  # (K, C)

    itemsize = max(jnp.dtype(x.dtype).itemsize, 4)
    budget, vmem_limit = _vmem_budget()

    TN = min(1024, _round_up(N, 8))
    if B == 1 and N >= 16:
        # keep >= 2 grid steps so both v7x TensorCores get work
        TN = min(TN, max(8, _round_up(_round_up(N, 8) // 2, 8)))
    per_row = 2 * (K + C) * itemsize                             # dbl-buffered rows
    avail = max(budget - 2 * K * C * itemsize, 1 << 20)
    TN = min(TN, max(8, (avail // per_row) // 8 * 8))
    N_pad = _round_up(N, TN)
    if N_pad != N:
        # zero-padded rows are normalized harmlessly (var+eps>0) and sliced off
        xp = jnp.pad(xp, ((0, 0), (0, N_pad - N), (0, 0)))

    out = pl.pallas_call(
        _embed_ln_kernel,
        out_shape=jax.ShapeDtypeStruct((B, N_pad, C), x.dtype),
        grid_spec=pltpu.PrefetchScalarGridSpec(
            num_scalar_prefetch=0,
            grid=(B, N_pad // TN),
            in_specs=[
                pl.BlockSpec((1, TN, K), lambda b, n: (b, n, 0)),
                pl.BlockSpec((K, C), lambda b, n: (0, 0)),
                pl.BlockSpec((1, C), lambda b, n: (0, 0)),
                pl.BlockSpec((1, C), lambda b, n: (0, 0)),
                pl.BlockSpec((1, C), lambda b, n: (0, 0)),
            ],
            out_specs=pl.BlockSpec((1, TN, C), lambda b, n: (b, n, 0)),
        ),
        compiler_params=pltpu.CompilerParams(
            dimension_semantics=("parallel", "parallel"),
            vmem_limit_bytes=vmem_limit,
        ),
    )(xp, w2, conv_b.reshape(1, C), ln_w.reshape(1, C), ln_b.reshape(1, C))

    out = out[:, :N, :]                                          # drop padded rows
    return out.transpose(0, 2, 1).reshape(B, C, Do, Ho, Wo)


# ---------------------------------------------------------------------------
# Standalone LayerNormChannel on channel-first [B, C, D, H, W]
# ---------------------------------------------------------------------------
def _ln_channel_kernel(x_ref, w_ref, b_ref, o_ref):
    # x_ref block: (1, C, G, T); w_ref / b_ref: (C, 1, 1).
    x = x_ref[0].astype(jnp.float32)                    # (C, G, T)
    u = jnp.mean(x, axis=0, keepdims=True)              # leading-axis VPU adds
    d = x - u
    s = jnp.mean(d * d, axis=0, keepdims=True)          # (1, G, T)
    inv = jax.lax.rsqrt(s + LN_CHANNEL_EPS)             # EUP rsqrt on small stats
    y = d * inv
    y = w_ref[...].astype(jnp.float32) * y + b_ref[...].astype(jnp.float32)
    o_ref[0] = y.astype(o_ref.dtype)


def _pick_tile(L, B, max_t):
    """Largest multiple of 128 dividing L, <= max_t; keep >=2 steps if B == 1."""
    cap = min(max_t, L)
    if B == 1 and L >= 256:
        cap = min(cap, (L // 2) // 128 * 128)
    cap = max(cap, 128)
    for cand in range(cap, 127, -128):
        if L % cand == 0:
            return cand
    return 128


def layer_norm_channel(x, weight, bias):
    """Channel-wise LayerNorm.  x: [B, C, D, H, W]; weight, bias: [C]."""
    B, C = x.shape[0], x.shape[1]
    S = math.prod(x.shape[2:])
    itemsize = jnp.dtype(x.dtype).itemsize
    G = 8 if itemsize >= 4 else 16                       # full sublane occupancy

    budget, vmem_limit = _vmem_budget()
    max_t = budget // (4 * C * G * itemsize)             # dbl-buffered in + out
    max_t = max(128, (max_t // 128) * 128)
    max_t = min(max_t, 64 * 1024)

    chunk = G * 128
    S_p = _round_up(S, chunk)
    L = S_p // G                                          # lane axis, multiple of 128
    T = _pick_tile(L, B, max_t)

    x_flat = x.reshape(B, C, S)
    if S_p != S:
        x_flat = jnp.pad(x_flat, ((0, 0), (0, 0), (0, S_p - S)))
    x4 = x_flat.reshape(B, C, G, L)
    w3 = weight.reshape(C, 1, 1)
    b3 = bias.reshape(C, 1, 1)

    out4 = pl.pallas_call(
        _ln_channel_kernel,
        out_shape=jax.ShapeDtypeStruct((B, C, G, L), x.dtype),
        grid_spec=pltpu.PrefetchScalarGridSpec(
            num_scalar_prefetch=0,
            grid=(B, L // T),
            in_specs=[
                pl.BlockSpec((1, C, G, T), lambda b, s: (b, 0, 0, s)),
                pl.BlockSpec((C, 1, 1), lambda b, s: (0, 0, 0)),
                pl.BlockSpec((C, 1, 1), lambda b, s: (0, 0, 0)),
            ],
            out_specs=pl.BlockSpec((1, C, G, T), lambda b, s: (b, 0, 0, s)),
        ),
        compiler_params=pltpu.CompilerParams(
            dimension_semantics=("parallel", "parallel"),
            vmem_limit_bytes=vmem_limit,
        ),
    )(x4, w3, b3)

    out = out4.reshape(B, C, S_p)
    if S_p != S:
        out = out[:, :, :S]
    return out.reshape(x.shape)


# ---------------------------------------------------------------------------
# References
# ---------------------------------------------------------------------------
def _embeddings_reference(x, conv_w, conv_b, ln_w, ln_b, patch):
    y = jax.lax.conv_general_dilated(
        x, conv_w, window_strides=patch, padding="VALID",
        dimension_numbers=("NCDHW", "OIDHW", "NCDHW"),
        precision=jax.lax.Precision.HIGHEST)
    y = y + conv_b[None, :, None, None, None]
    u = jnp.mean(y, axis=1, keepdims=True)
    s = jnp.mean((y - u) ** 2, axis=1, keepdims=True)
    yn = (y - u) / jnp.sqrt(s + LN_CHANNEL_EPS)
    return ln_w[None, :, None, None, None] * yn + ln_b[None, :, None, None, None]


def _ln_channel_reference(x, weight, bias):
    u = jnp.mean(x, axis=1, keepdims=True)
    s = jnp.mean((x - u) ** 2, axis=1, keepdims=True)
    xn = (x - u) / jnp.sqrt(s + LN_CHANNEL_EPS)
    return (weight[None, :, None, None, None] * xn
            + bias[None, :, None, None, None])


if __name__ == "__main__":
    key = jax.random.PRNGKey(0)
    ks = jax.random.split(key, 10)

    # ---- Case 1: Embeddings (patch-embed + channel LN), config default
    # hidden=128, module-faithful LN init (ones / zeros). ----
    B, Cin, D, H, W = 2, 1, 8, 16, 16
    hidden, patch = 128, (2, 2, 2)
    x = jax.random.normal(ks[0], (B, Cin, D, H, W), dtype=jnp.float32)
    conv_w = jax.random.normal(ks[1], (hidden, Cin) + patch, dtype=jnp.float32) * 0.2
    conv_b = jax.random.normal(ks[2], (hidden,), dtype=jnp.float32) * 0.1
    ln_w = jnp.ones((hidden,), dtype=jnp.float32)
    ln_b = jnp.zeros((hidden,), dtype=jnp.float32)
    out1 = jax.block_until_ready(
        embeddings_forward(x, conv_w, conv_b, ln_w, ln_b, patch))
    ref1 = _embeddings_reference(x, conv_w, conv_b, ln_w, ln_b, patch)
    assert out1.shape == ref1.shape
    assert jnp.allclose(out1, ref1, atol=2e-4, rtol=2e-4), "embeddings case 1 mismatch"

    # ---- Case 2: ragged spatial dims, B=1, non-128 hidden, random affine. ----
    B2, Cin2 = 1, 2
    D2, H2, W2 = 5, 9, 11
    hidden2, patch2 = 48, (1, 2, 3)
    x2 = jax.random.normal(ks[3], (B2, Cin2, D2, H2, W2), dtype=jnp.float32)
    conv_w2 = jax.random.normal(ks[4], (hidden2, Cin2) + patch2, dtype=jnp.float32) * 0.3
    conv_b2 = jax.random.normal(ks[5], (hidden2,), dtype=jnp.float32) * 0.1
    ln_w2 = jax.random.normal(ks[6], (hidden2,), dtype=jnp.float32)
    ln_b2 = jax.random.normal(ks[7], (hidden2,), dtype=jnp.float32)
    out2 = jax.block_until_ready(
        embeddings_forward(x2, conv_w2, conv_b2, ln_w2, ln_b2, patch2))
    ref2 = _embeddings_reference(x2, conv_w2, conv_b2, ln_w2, ln_b2, patch2)
    assert out2.shape == ref2.shape
    assert jnp.allclose(out2, ref2, atol=2e-4, rtol=2e-4), "embeddings case 2 mismatch"

    # ---- Case 3: standalone LayerNormChannel kernel (ragged spatial, B=1). ----
    B3, C3, D3, H3, W3 = 1, 6, 5, 7, 9
    x3 = jax.random.normal(ks[8], (B3, C3, D3, H3, W3), dtype=jnp.float32)
    w3 = jax.random.normal(ks[9], (C3,), dtype=jnp.float32)
    b3 = jax.random.normal(ks[0], (C3,), dtype=jnp.float32)
    out3 = jax.block_until_ready(layer_norm_channel(x3, w3, b3))
    ref3 = _ln_channel_reference(x3, w3, b3)
    assert out3.shape == x3.shape
    assert jnp.allclose(out3, ref3, atol=1e-5, rtol=1e-5), "layer_norm_channel mismatch"

    print("KERNEL_OK")
</pallas_src>

<mosaic_0001>
module attributes {stable_mosaic.version = 11 : i64} {
  func.func @_embed_ln_kernel(%arg0: i32, %arg1: i32, %arg2: memref<1x256x8xf32, #tpu.memory_space<vmem>>, %arg3: memref<8x128xf32, #tpu.memory_space<vmem>>, %arg4: memref<1x128xf32, #tpu.memory_space<vmem>>, %arg5: memref<1x128xf32, #tpu.memory_space<vmem>>, %arg6: memref<1x128xf32, #tpu.memory_space<vmem>>, %arg7: memref<1x256x128xf32, #tpu.memory_space<vmem>>) attributes {dimension_semantics = [#tpu.dimension_semantics<parallel>, #tpu.dimension_semantics<parallel>], iteration_bounds = array<i64: 2, 1>, scalar_prefetch = 0 : i64, scratch_operands = 0 : i64, tpu.core_type = #tpu.core_type<tc>, window_params = [{transform_indices = @transform_0, window_bounds = array<i64: 1, 256, 8>}, {pipeline_mode = #tpu.pipeline_mode<synchronous>, transform_indices = @transform_1, window_bounds = array<i64: 8, 128>}, {pipeline_mode = #tpu.pipeline_mode<synchronous>, transform_indices = @transform_2, window_bounds = array<i64: 1, 128>}, {pipeline_mode = #tpu.pipeline_mode<synchronous>, transform_indices = @transform_3, window_bounds = array<i64: 1, 128>}, {pipeline_mode = #tpu.pipeline_mode<synchronous>, transform_indices = @transform_4, window_bounds = array<i64: 1, 128>}, {transform_indices = @transform_5, window_bounds = array<i64: 1, 256, 128>}]} {
    %c0 = arith.constant 0 : index
    %c0_0 = arith.constant 0 : index
    %c0_1 = arith.constant 0 : index
    %0 = vector.load %arg2[%c0, %c0_0, %c0_1] : memref<1x256x8xf32, #tpu.memory_space<vmem>>, vector<1x256x8xf32>
    %1 = vector.shape_cast %0 : vector<1x256x8xf32> to vector<256x8xf32>
    %c0_2 = arith.constant 0 : index
    %c0_3 = arith.constant 0 : index
    %2 = vector.load %arg3[%c0_2, %c0_3] : memref<8x128xf32, #tpu.memory_space<vmem>>, vector<8x128xf32>
    %cst = arith.constant dense<0.000000e+00> : vector<256x128xf32>
    %3 = tpu.matmul %1, %2, %cst {dimension_numbers = #tpu.dot_dimension_numbers<[1], [0], [0], [1], [0, 0, 1, 1], [], []>} : vector<256x8xf32>, vector<8x128xf32>, vector<256x128xf32> -> vector<256x128xf32>
    %c0_4 = arith.constant 0 : index
    %c0_5 = arith.constant 0 : index
    %4 = vector.load %arg4[%c0_4, %c0_5] : memref<1x128xf32, #tpu.memory_space<vmem>>, vector<1x128xf32>
    %5 = vector.broadcast %4 : vector<1x128xf32> to vector<256x128xf32>
    %6 = arith.addf %3, %5 : vector<256x128xf32>
    %cst_6 = arith.constant dense<0.000000e+00> : vector<256xf32>
    %7 = vector.multi_reduction <add>, %6, %cst_6 [1] : vector<256x128xf32> to vector<256xf32>
    %8 = vector.shape_cast %7 : vector<256xf32> to vector<256x1xf32>
    %cst_7 = arith.constant 1.280000e+02 : f32
    %9 = vector.broadcast %cst_7 : f32 to vector<256x1xf32>
    %10 = arith.divf %8, %9 : vector<256x1xf32>
    %11 = vector.broadcast %10 : vector<256x1xf32> to vector<256x128xf32>
    %12 = arith.subf %6, %11 : vector<256x128xf32>
    %13 = arith.mulf %12, %12 : vector<256x128xf32>
    %cst_8 = arith.constant dense<0.000000e+00> : vector<256xf32>
    %14 = vector.multi_reduction <add>, %13, %cst_8 [1] : vector<256x128xf32> to vector<256xf32>
    %15 = vector.shape_cast %14 : vector<256xf32> to vector<256x1xf32>
    %cst_9 = arith.constant 1.280000e+02 : f32
    %16 = vector.broadcast %cst_9 : f32 to vector<256x1xf32>
    %17 = arith.divf %15, %16 : vector<256x1xf32>
    %cst_10 = arith.constant 9.99999974E-6 : f32
    %18 = vector.broadcast %cst_10 : f32 to vector<256x1xf32>
    %19 = arith.addf %17, %18 : vector<256x1xf32>
    %20 = math.rsqrt %19 : vector<256x1xf32>
    %21 = vector.broadcast %20 : vector<256x1xf32> to vector<256x128xf32>
    %22 = arith.mulf %12, %21 : vector<256x128xf32>
    %c0_11 = arith.constant 0 : index
    %c0_12 = arith.constant 0 : index
    %23 = vector.load %arg5[%c0_11, %c0_12] : memref<1x128xf32, #tpu.memory_space<vmem>>, vector<1x128xf32>
    %24 = vector.broadcast %23 : vector<1x128xf32> to vector<256x128xf32>
    %25 = arith.mulf %24, %22 : vector<256x128xf32>
    %c0_13 = arith.constant 0 : index
    %c0_14 = arith.constant 0 : index
    %26 = vector.load %arg6[%c0_13, %c0_14] : memref<1x128xf32, #tpu.memory_space<vmem>>, vector<1x128xf32>
    %27 = vector.broadcast %26 : vector<1x128xf32> to vector<256x128xf32>
    %28 = arith.addf %25, %27 : vector<256x128xf32>
    %c0_15 = arith.constant 0 : index
    %c0_16 = arith.constant 0 : index
    %c0_17 = arith.constant 0 : index
    %29 = vector.load %arg7[%c0_15, %c0_16, %c0_17] : memref<1x256x128xf32, #tpu.memory_space<vmem>>, vector<1x256x128xf32>
    %30 = vector.shape_cast %29 : vector<1x256x128xf32> to vector<256x128xf32>
    %31 = vector.shape_cast %28 : vector<256x128xf32> to vector<1x256x128xf32>
    tpu.vector_store %arg7[%c0_15, %c0_16, %c0_17], %31 {strides = array<i32>} : memref<1x256x128xf32, #tpu.memory_space<vmem>>, vector<1x256x128xf32>,
    return
  }
  func.func @transform_0(%arg0: i32, %arg1: i32) -> (i32, i32, i32) {
    %c0_i32 = arith.constant 0 : i32
    %c0_i32_0 = arith.constant 0 : i32
    return %arg0, %arg1, %c0_i32 : i32, i32, i32
  }
  func.func @transform_1(%arg0: i32, %arg1: i32) -> (i32, i32) {
    %c0_i32 = arith.constant 0 : i32
    %c0_i32_0 = arith.constant 0 : i32
    %c0_i32_1 = arith.constant 0 : i32
    return %c0_i32, %c0_i32_0 : i32, i32
  }
  func.func @transform_2(%arg0: i32, %arg1: i32) -> (i32, i32) {
    %c0_i32 = arith.constant 0 : i32
    %c0_i32_0 = arith.constant 0 : i32
    %c0_i32_1 = arith.constant 0 : i32
    return %c0_i32, %c0_i32_0 : i32, i32
  }
  func.func @transform_3(%arg0: i32, %arg1: i32) -> (i32, i32) {
    %c0_i32 = arith.constant 0 : i32
    %c0_i32_0 = arith.constant 0 : i32
    %c0_i32_1 = arith.constant 0 : i32
    return %c0_i32, %c0_i32_0 : i32, i32
  }
  func.func @transform_4(%arg0: i32, %arg1: i32) -> (i32, i32) {
    %c0_i32 = arith.constant 0 : i32
    %c0_i32_0 = arith.constant 0 : i32
    %c0_i32_1 = arith.constant 0 : i32
    return %c0_i32, %c0_i32_0 : i32, i32
  }
  func.func @transform_5(%arg0: i32, %arg1: i32) -> (i32, i32, i32) {
    %c0_i32 = arith.constant 0 : i32
    %c0_i32_0 = arith.constant 0 : i32
    return %arg0, %arg1, %c0_i32 : i32, i32, i32
  }
}

</mosaic_0001>

<bundles_post_ra>
// kernel: tpu_custom_call.1
= control target key start
LH: loop header
LB: loop body
LE: loop exit
PB: predicated region body
PF: predicated region fallthrough
CT: control target
= control target key end

     0   :  { %10 = vsyncpa [#allocation3], 0  ;;  %s2165_s0 = inlined_call_operand.vmem [shape: f32[2,256,8], index: 0, kind: input, shape index: {}]   ;;  %s2166_s1 = inlined_call_operand.vmem [shape: f32[8,128], index: 1, kind: input, shape index: {}]   ;;  %s2167_s2 = inlined_call_operand.vmem [shape: f32[1,128], index: 2, kind: input, shape index: {}]   ;;  %s2168_s3 = inlined_call_operand.vmem [shape: f32[1,128], index: 3, kind: input, shape index: {}]   ;;  %s2169_s4 = inlined_call_operand.vmem [shape: f32[1,128], index: 4, kind: input, shape index: {}]   ;;  %s2170_s5 = inlined_call_operand.hbm [shape: f32[2,256,128], index: 5, kind: output, shape index: {}]  }
   0x1   :  { %12 = vsyncpa [#allocation3 + $0x1], 0  ;;  %s1543_s18 = smov 0   ;;  %s1545_s19 = smov 0  }
   0x2   :  { %s1547_s20 = smov 0   ;;  %s1549_s21 = smov 0  }
   0x3   :  { %s1551_s22 = smov 0   ;;  %s1553_s23 = smov 0  }
   0x4 LB: > { %s1174_s24 = sadd.s32 4294967295, %s1508_s23   ;;  %s1175_s25 = sadd.s32 4294967294, %s1508_s23   ;;  %s1508_s23 = sphi %s1553_s23, %s18_s23   ;;  %s1504_s22 = sphi %s1551_s22, %s2177_s22   ;;  %s1500_s21 = sphi %s1549_s21, %s2176_s21   ;;  %s1496_s20 = sphi %s1547_s20, %s2175_s20   ;;  %s1492_s19 = sphi %s1545_s19, %s2174_s19   ;;  %s1488_s18 = sphi %s1543_s18, %s2173_s18  }
   0x5   : > { %s30_s26 = sadd.s32 1, %s1504_s22  ;;  %s151_s27 = sadd.s32 1, %s1496_s20 }
   0x6   : > { %p32_p0 = scmp.ge.s32.totalorder %s30_s26, 2  ;;  %p161_p1 = scmp.ne.s32.totalorder %s1496_s20, %s1492_s19 }
   0x7   : > { %p162_p2 = scmp.eq.s32.totalorder %s1174_s24, 1  ;;  %p167_p3 = scmp.ne.s32.totalorder %s1492_s19, %s1488_s18 }
   0x8   : > { %s2179_s26 = smov (%p32_p0, %s30_s26), 0  ;;  %p168_p5 = scmp.eq.s32.totalorder %s1175_s25, 1 }
   0x9   : > { %p1583_p4 = por %p162_p2, %p161_p1  ;;  %s146_s29 = ssub.s32 %s1504_s22, %s2179_s26 }
   0xa   : > { %p1178_p6 = scmp.ge.s32.totalorder %s1508_s23, 1  ;;  %p149_p7 = scmp.eq.s32.totalorder %s146_s29, 0 }
   0xb   : > { %p1590_p8 = por %p168_p5, %p167_p3  ;;  %p211_p9 = scmp.lt.s32.totalorder %s1508_s23, 3 }
   0xc   : > { %s1596_s6 = scalar_select %p149_p7, %s1496_s20, %s151_s27  }
   0xd   : > { %p212_p10 = pnand %p1178_p6, %p211_p9 }
   0xe   : > { %v286_v0 = vld [vmem:[%s2166_s1] sm:$0xff] (!%p212_p10)  ;;  %p244_p11 = scmp.lt.s32.totalorder (!%p212_p10), %s1500_s21, 1  ;;  %vm294_vm0 = vcmask (!%p212_p10), 64512   ;;  %s240_s16 = sand.u32 (!%p212_p10), 1, %s1492_s19  }
   0xf   : > { %215 = sbr.rel (%p212_p10) target bundleno = 634 (0x27a), region = 40  ;;  %1257 = vmatprep.subr.mxu0 (!%p212_p10), %v286_v0  ;;  %1307 = vmatprep.subr.mxu1 (!%p212_p10), %v286_v0  ;;  %v1675_v33 = vld [vmem:[%s2167_s2] ss:$0 sm:$0xff] (!%p212_p10)  ;;  %s1179_s25 = sshll.u32 (!%p212_p10), %s240_s16, 8 }
  0x10   : > { %1258 = vmatpush3.msra.mxu0 (!%p212_p10), %v286_v0  ;;  %1308 = vmatpush3.msra.mxu1 (!%p212_p10), %v286_v0  ;;  %s1983_s7 = scalar_lea.vmem (!%p212_p10), [#allocation2], %s1179_s25  ;;  %s1223_s8 = sshll.u32 (!%p212_p10), %s1500_s21, 12 }
  0x11   : > { %s2111_s12 = scalar_lea.hbm (!%p212_p10), %s2170_s5, %s1223_s8  ;;  %s1510_s14 = smov (!%p212_p10), [#allocation2]  }
  0x12   : > { %s1434_s15 = sshll.u32 (!%p212_p10), %s1510_s14, 4  ;;  %s1435_s15 = int_to_ptr.vmem [resolvable:$false] %s1434_s15 }
  0x13   : > { %s1436_s17 = scalar_lea.vmem (!%p212_p10), %s1435_s15, 8192 }
  0x16   : > { %s245_s9 = scalar_select %p244_p11, %s1500_s21, 1 }
  0x17   : > { %s2119_s21 = scalar_lea.sflag [#allocation3], %s240_s16 }
  0x18   : > { %s1222_s10 = sshll.u32 %s245_s9, 8  ;;  %s1095_s9 = sshll.u32 %s1983_s7, 4  ;;  %s2113_s9 = int_to_ptr.vmem [resolvable:$true] %s1095_s9 }
  0x19   : > { %s1606_s13 = scalar_lea.vmem %s2165_s0, %s1222_s10  ;;  %p1437_p1 = scmp.lt.s32.totalorder %s2113_s9, %s1435_s15 }
  0x1a   : > { %v254_v1 = vld [vmem:[%s1606_s13] sm:$0xff]  ;;  %v255_v3 = vld [vmem:[%s1606_s13 + $0x8] sm:$0xff]  ;;  %v256_v5 = vld [vmem:[%s1606_s13 + $0x10] sm:$0xff] }
  0x1b   : > { %v270_v2 = vld [vmem:[%s1606_s13 + $0x80] sm:$0xff]  ;;  %1259 = vmatprep.mubr.msk.f32.mxu0 %vm294_vm0, %v254_v1  ;;  %v271_v4 = vld [vmem:[%s1606_s13 + $0x88] sm:$0xff]  ;;  %v272_v6 = vld [vmem:[%s1606_s13 + $0x90] sm:$0xff] }
  0x1c   : > { %1283 = vmatprep.mubr.msk.f32.mxu1 %vm294_vm0, %v270_v2  ;;  %1260 = vmatmul.mubr.msk.f32.vlgmr.msra.gmra.mrb[0].mxu0 %vm294_vm0, %v255_v3  ;;  %v257_v7 = vld [vmem:[%s1606_s13 + $0x18] sm:$0xff]  ;;  %v258_v9 = vld [vmem:[%s1606_s13 + $0x20] sm:$0xff]  ;;  %v259_v11 = vld [vmem:[%s1606_s13 + $0x28] sm:$0xff] }
  0x1d   : > { %1284 = vmatmul.mubr.msk.f32.vlgmr.msra.gmra.mrb[0].mxu1 %vm294_vm0, %v271_v4  ;;  %1262 = vmatprep.mubr.msk.f32.mxu0 %vm294_vm0, %v256_v5  ;;  %v273_v8 = vld [vmem:[%s1606_s13 + $0x98] sm:$0xff]  ;;  %v274_v10 = vld [vmem:[%s1606_s13 + $0xa0] sm:$0xff]  ;;  %v275_v12 = vld [vmem:[%s1606_s13 + $0xa8] sm:$0xff] }
  0x1e   : > { %1286 = vmatprep.mubr.msk.f32.mxu1 %vm294_vm0, %v272_v6  ;;  %v260_v13 = vld [vmem:[%s1606_s13 + $0x30] sm:$0xff]  ;;  %v261_v15 = vld [vmem:[%s1606_s13 + $0x38] sm:$0xff]  ;;  %v262_v17 = vld [vmem:[%s1606_s13 + $0x40] sm:$0xff] }
  0x1f   : > { %v276_v14 = vld [vmem:[%s1606_s13 + $0xb0] sm:$0xff]  ;;  %v277_v16 = vld [vmem:[%s1606_s13 + $0xb8] sm:$0xff]  ;;  %v278_v18 = vld [vmem:[%s1606_s13 + $0xc0] sm:$0xff] }
  0x20   : > { %1263 = vmatmul.mubr.msk.f32.gmra.mrb[2].mxu0 %vm294_vm0, %v257_v7  ;;  %v263_v19 = vld [vmem:[%s1606_s13 + $0x48] sm:$0xff]  ;;  %v264_v21 = vld [vmem:[%s1606_s13 + $0x50] sm:$0xff]  ;;  %v265_v23 = vld [vmem:[%s1606_s13 + $0x58] sm:$0xff] }
  0x21   : > { %1287 = vmatmul.mubr.msk.f32.gmra.mrb[2].mxu1 %vm294_vm0, %v273_v8  ;;  %1265 = vmatprep.mubr.msk.f32.mxu0 %vm294_vm0, %v258_v9  ;;  %v279_v20 = vld [vmem:[%s1606_s13 + $0xc8] sm:$0xff]  ;;  %v280_v22 = vld [vmem:[%s1606_s13 + $0xd0] sm:$0xff]  ;;  %v281_v24 = vld [vmem:[%s1606_s13 + $0xd8] sm:$0xff] }
  0x22   : > { %1289 = vmatprep.mubr.msk.f32.mxu1 %vm294_vm0, %v274_v10  ;;  %v266_v25 = vld [vmem:[%s1606_s13 + $0x60] sm:$0xff]  ;;  %v267_v27 = vld [vmem:[%s1606_s13 + $0x68] sm:$0xff]  ;;  %v268_v29 = vld [vmem:[%s1606_s13 + $0x70] sm:$0xff] }
  0x23   : > { %v282_v26 = vld [vmem:[%s1606_s13 + $0xe0] sm:$0xff]  ;;  %v283_v28 = vld [vmem:[%s1606_s13 + $0xe8] sm:$0xff]  ;;  %v284_v30 = vld [vmem:[%s1606_s13 + $0xf0] sm:$0xff] }
  0x24   : > { %1266 = vmatmul.mubr.msk.f32.gmra.mrb[4].mxu0 %vm294_vm0, %v259_v11  ;;  %v269_v31 = vld [vmem:[%s1606_s13 + $0x78] sm:$0xff] }
  0x25   : > { %1290 = vmatmul.mubr.msk.f32.gmra.mrb[4].mxu1 %vm294_vm0, %v275_v12  ;;  %1268 = vmatprep.mubr.msk.f32.mxu0 %vm294_vm0, %v260_v13  ;;  %v285_v32 = vld [vmem:[%s1606_s13 + $0xf8] sm:$0xff]  ;;  %s1430_s13 = scalar_lea.vmem %s2113_s9, 4096 }
  0x26   : > { %1292 = vmatprep.mubr.msk.f32.mxu1 %vm294_vm0, %v276_v14  ;;  %p1431_p12 = scmp.ne.s32.totalorder %s2113_s9, %s1430_s13  ;;  %p1438_p2 = scmp.lt.s32.totalorder %s1436_s17, %s1430_s13 }
  0x28   : > { %1269 = vmatmul.mubr.msk.f32.gmra.mrb[6].mxu0 %vm294_vm0, %v261_v15  ;;  %p1432_p13 = pnand %p1431_p12, %p1583_p4  ;;  %p1439_p3 = por %p1438_p2, %p1437_p1 }
  0x29   : > { %1293 = vmatmul.mubr.msk.f32.gmra.mrb[6].mxu1 %vm294_vm0, %v277_v16  ;;  %1271 = vmatprep.mubr.msk.f32.mxu0 %vm294_vm0, %v262_v17 }
  0x2a   : > { %1295 = vmatprep.mubr.msk.f32.mxu1 %vm294_vm0, %v278_v18  ;;  %p1433_p0 = pneg %p1432_p13 }
  0x2c   : > { %1272 = vmatmul.mubr.msk.f32.gmra.mrb[8].mxu0 %vm294_vm0, %v263_v19  ;;  %p1440_p5 = pnand %p1439_p3, %p1433_p0 }
  0x2d   : > { %1296 = vmatmul.mubr.msk.f32.gmra.mrb[8].mxu1 %vm294_vm0, %v279_v20  ;;  %1274 = vmatprep.mubr.msk.f32.mxu0 %vm294_vm0, %v264_v21 }
  0x2e   : > { %1298 = vmatprep.mubr.msk.f32.mxu1 %vm294_vm0, %v280_v22 }
  0x30   : > { %1275 = vmatmul.mubr.msk.f32.gmra.mrb[10].mxu0 %vm294_vm0, %v265_v23 }
  0x31   : > { %1299 = vmatmul.mubr.msk.f32.gmra.mrb[10].mxu1 %vm294_vm0, %v281_v24  ;;  %1277 = vmatprep.mubr.msk.f32.mxu0 %vm294_vm0, %v266_v25 }
  0x32   : > { %1301 = vmatprep.mubr.msk.f32.mxu1 %vm294_vm0, %v282_v26 }
  0x34   : > { %1278 = vmatmul.mubr.msk.f32.gmra.mrb[12].mxu0 %vm294_vm0, %v267_v27 }
  0x35   : > { %1302 = vmatmul.mubr.msk.f32.gmra.mrb[12].mxu1 %vm294_vm0, %v283_v28  ;;  %1280 = vmatprep.mubr.msk.f32.mxu0 %vm294_vm0, %v268_v29 }
  0x36   : > { %1304 = vmatprep.mubr.msk.f32.mxu1 %vm294_vm0, %v284_v30 }
  0x38   : > { %1281 = vmatmul.mubr.msk.f32.gmra.mrb[14].mxu0 %vm294_vm0, %v269_v31 }
  0x39   : > { %1305 = vmatmul.mubr.msk.f32.gmra.mrb[14].mxu1 %vm294_vm0, %v285_v32 }
  0xef   : > { %v1261_v34 = vpop.f32.mrb[0].mxu0 }
  0xf0   : > { %v1285_v35 = vpop.f32.mrb[0].mxu1  ;;  %v1678_v36 = vadd.f32 %v1261_v34, %v1675_v33  ;;  %v457_v38 = vpop.f32.mrb[1].mxu0 }
  0xf1   : > { %v1681_v37 = vadd.f32 %v1285_v35, %v1675_v33  ;;  %v537_v39 = vpop.f32.mrb[1].mxu1  ;;  %v1686_v42 = vadd.f32 %v1675_v33, %v457_v38 }
  0xf2   : > { %618 = vadd.xlane.f32.xlu0 %v1678_v36  ;;  %v1697_v49 = vadd.f32 %v1675_v33, %v537_v39 }
  0xf3   : > { %650 = vadd.xlane.f32.xlu1 %v1681_v37  ;;  %v1264_v40 = vpop.f32.mrb[2].mxu0 }
  0xf4   : > { %v1288_v41 = vpop.f32.mrb[2].mxu1  ;;  %v1689_v43 = vadd.f32 %v1264_v40, %v1675_v33  ;;  %v467_v44 = vpop.f32.mrb[3].mxu0 }
  0xf5   : > { %v547_v45 = vpop.f32.mrb[3].mxu1  ;;  %v1692_v46 = vadd.f32 %v1288_v41, %v1675_v33  ;;  %v1702_v54 = vadd.f32 %v1675_v33, %v467_v44 }
  0xf6   : > { %616 = vadd.xlane.f32.xlu0 %v1686_v42  ;;  %v1705_v55 = vadd.f32 %v1675_v33, %v547_v45 }
  0xf7   : > { %622 = vadd.xlane.f32.xlu1 %v1689_v43  ;;  %v1267_v47 = vpop.f32.mrb[4].mxu0 }
  0xf8   : > { %v1291_v48 = vpop.f32.mrb[4].mxu1  ;;  %v477_v50 = vpop.f32.mrb[5].mxu0  ;;  %v1708_v58 = vadd.f32 %v1267_v47, %v1675_v33 }
  0xf9   : > { %v557_v51 = vpop.f32.mrb[5].mxu1  ;;  %v1713_v59 = vadd.f32 %v1675_v33, %v477_v50  ;;  %v1716_v0 = vadd.f32 %v1291_v48, %v1675_v33 }
  0xfa   : > { %648 = vadd.xlane.f32.xlu0 %v1697_v49  ;;  %v1721_v1 = vadd.f32 %v1675_v33, %v557_v51 }
  0xfb   : > { %654 = vadd.xlane.f32.xlu1 %v1692_v46  ;;  %v1270_v52 = vpop.f32.mrb[6].mxu0 }
  0xfc   : > { %v1294_v53 = vpop.f32.mrb[6].mxu1  ;;  %v487_v56 = vpop.f32.mrb[7].mxu0  ;;  %v1724_v6 = vadd.f32 %v1270_v52, %v1675_v33 }
  0xfd   : > { %v567_v57 = vpop.f32.mrb[7].mxu1  ;;  %v1729_v7 = vadd.f32 %v1675_v33, %v487_v56  ;;  %v1732_v12 = vadd.f32 %v1294_v53, %v1675_v33 }
  0xfe   : > { %652 = vadd.xlane.f32.xlu0 %v1705_v55  ;;  %v1737_v13 = vadd.f32 %v1675_v33, %v567_v57 }
  0xff   : > { %620 = vadd.xlane.f32.xlu1 %v1702_v54  ;;  %v1273_v60 = vpop.f32.mrb[8].mxu0 }
 0x100   : > { %v1297_v61 = vpop.f32.mrb[8].mxu1  ;;  %v497_v62 = vpop.f32.mrb[9].mxu0  ;;  %v1740_v18 = vadd.f32 %v1273_v60, %v1675_v33 }
 0x101   : > { %v577_v63 = vpop.f32.mrb[9].mxu1  ;;  %v1745_v19 = vadd.f32 %v1675_v33, %v497_v62  ;;  %v1748_v20 = vadd.f32 %v1297_v61, %v1675_v33 }
 0x102   : > { %624 = vadd.xlane.f32.xlu0 %v1713_v59  ;;  %v1753_v21 = vadd.f32 %v1675_v33, %v577_v63 }
 0x103   : > { %626 = vadd.xlane.f32.xlu1 %v1708_v58  ;;  %v1276_v2 = vpop.f32.mrb[10].mxu0 }
 0x104   : > { %v1300_v3 = vpop.f32.mrb[10].mxu1  ;;  %v507_v4 = vpop.f32.mrb[11].mxu0  ;;  %v1756_v22 = vadd.f32 %v1276_v2, %v1675_v33 }
 0x105   : > { %v587_v5 = vpop.f32.mrb[11].mxu1  ;;  %v1761_v23 = vadd.f32 %v1675_v33, %v507_v4  ;;  %v1764_v24 = vadd.f32 %v1300_v3, %v1675_v33 }
 0x106   : > { %656 = vadd.xlane.f32.xlu0 %v1721_v1  ;;  %v1769_v25 = vadd.f32 %v1675_v33, %v587_v5 }
 0x107   : > { %658 = vadd.xlane.f32.xlu1 %v1716_v0  ;;  %v1279_v8 = vpop.f32.mrb[12].mxu0 }
 0x108   : > { %v1303_v9 = vpop.f32.mrb[12].mxu1  ;;  %v517_v10 = vpop.f32.mrb[13].mxu0  ;;  %v1772_v26 = vadd.f32 %v1279_v8, %v1675_v33 }
 0x109   : > { %v597_v11 = vpop.f32.mrb[13].mxu1  ;;  %v1777_v27 = vadd.f32 %v1675_v33, %v517_v10  ;;  %v1780_v28 = vadd.f32 %v1303_v9, %v1675_v33 }
 0x10a   : > { %628 = vadd.xlane.f32.xlu0 %v1729_v7  ;;  %v1785_v29 = vadd.f32 %v1675_v33, %v597_v11 }
 0x10b   : > { %630 = vadd.xlane.f32.xlu1 %v1724_v6  ;;  %v1282_v14 = vpop.f32.mrb[14].mxu0 }
 0x10c   : > { %v1306_v15 = vpop.f32.mrb[14].mxu1  ;;  %v527_v16 = vpop.f32.mrb[15].mxu0  ;;  %v1788_v30 = vadd.f32 %v1282_v14, %v1675_v33 }
 0x10d   : > { %v607_v17 = vpop.f32.mrb[15].mxu1  ;;  %v1793_v31 = vadd.f32 %v1675_v33, %v527_v16  ;;  %v1796_v32 = vadd.f32 %v1306_v15, %v1675_v33 }
 0x10e   : > { %660 = vadd.xlane.f32.xlu0 %v1737_v13  ;;  %v1801_v34 = vadd.f32 %v1675_v33, %v607_v17 }
 0x10f   : > { %662 = vadd.xlane.f32.xlu1 %v1732_v12 }
 0x112   : > { %632 = vadd.xlane.f32.xlu0 %v1745_v19 }
 0x113   : > { %634 = vadd.xlane.f32.xlu1 %v1740_v18 }
 0x116   : > { %664 = vadd.xlane.f32.xlu0 %v1753_v21 }
 0x117   : > { %666 = vadd.xlane.f32.xlu1 %v1748_v20 }
 0x11a   : > { %636 = vadd.xlane.f32.xlu0 %v1761_v23 }
 0x11b   : > { %638 = vadd.xlane.f32.xlu1 %v1756_v22 }
 0x11e   : > { %668 = vadd.xlane.f32.xlu0 %v1769_v25 }
 0x11f   : > { %670 = vadd.xlane.f32.xlu1 %v1764_v24 }
 0x122   : > { %640 = vadd.xlane.f32.xlu0 %v1777_v27 }
 0x123   : > { %642 = vadd.xlane.f32.xlu1 %v1772_v26 }
 0x126   : > { %672 = vadd.xlane.f32.xlu0 %v1785_v29 }
 0x127   : > { %674 = vadd.xlane.f32.xlu1 %v1780_v28 }
 0x12a   : > { %644 = vadd.xlane.f32.xlu0 %v1793_v31 }
 0x12b   : > { %646 = vadd.xlane.f32.xlu1 %v1788_v30 }
 0x12e   : > { %676 = vadd.xlane.f32.xlu0 %v1801_v34 }
 0x12f   : > { %678 = vadd.xlane.f32.xlu1 %v1796_v32 }
 0x17f   : > { %v619_v38 = vpop.xlane.xlu0 %618 }
 0x180   : > { %v651_v35 = vpop.xlane.xlu1 %650  ;;  %v682_v40 = vmul.f32 0.0078125, %v619_v38 }
 0x181   : > { %v698_v39 = vmul.f32 0.0078125, %v651_v35 }
 0x182   : > { %v1806_v41 = vsub.f32 %v1678_v36, %v682_v40 }
 0x183   : > { %v617_v45 = vpop.xlane.xlu0 %616  ;;  %v1809_v47 = vsub.f32 %v1681_v37, %v698_v39 }
 0x184   : > { %v623_v44 = vpop.xlane.xlu1 %622  ;;  %v681_v50 = vmul.f32 0.0078125, %v617_v45  ;;  %v746_v33 = vmul.f32 %v1806_v41, %v1806_v41 }
 0x185   : > { %v684_v48 = vmul.f32 0.0078125, %v623_v44  ;;  %v762_v37 = vmul.f32 %v1809_v47, %v1809_v47 }
 0x186   : > { %v1814_v51 = vsub.f32 %v1686_v42, %v681_v50  ;;  %779 = vadd.xlane.f32.xlu1 %v746_v33 }
 0x187   : > { %v1817_v52 = vsub.f32 %v1689_v43, %v684_v48  ;;  %v649_v36 = vpop.xlane.xlu0 %648 }
 0x188   : > { %v655_v53 = vpop.xlane.xlu1 %654  ;;  %v697_v57 = vmul.f32 0.0078125, %v649_v36  ;;  %v745_v60 = vmul.f32 %v1814_v51, %v1814_v51 }
 0x189   : > { %v700_v56 = vmul.f32 0.0078125, %v655_v53  ;;  %v748_v43 = vmul.f32 %v1817_v52, %v1817_v52 }
 0x18a   : > { %v1824_v61 = vsub.f32 %v1697_v49, %v697_v57  ;;  %811 = vadd.xlane.f32.xlu1 %v762_v37  ;;  %777 = vadd.xlane.f32.xlu0 %v745_v60 }
 0x18b   : > { %v653_v62 = vpop.xlane.xlu0 %652  ;;  %v1829_v63 = vsub.f32 %v1692_v46, %v700_v56 }
 0x18c   : > { %v621_v42 = vpop.xlane.xlu1 %620  ;;  %v699_v3 = vmul.f32 0.0078125, %v653_v62  ;;  %v761_v4 = vmul.f32 %v1824_v61, %v1824_v61 }
 0x18d   : > { %v683_v2 = vmul.f32 0.0078125, %v621_v42  ;;  %v764_v46 = vmul.f32 %v1829_v63, %v1829_v63 }
 0x18e   : > { %783 = vadd.xlane.f32.xlu1 %v748_v43  ;;  %809 = vadd.xlane.f32.xlu0 %v761_v4  ;;  %v1837_v49 = vsub.f32 %v1705_v55, %v699_v3 }
 0x18f   : > { %v1834_v5 = vsub.f32 %v1702_v54, %v683_v2  ;;  %v625_v9 = vpop.xlane.xlu0 %624 }
 0x190   : > { %v627_v8 = vpop.xlane.xlu1 %626  ;;  %v685_v11 = vmul.f32 0.0078125, %v625_v9  ;;  %v763_v55 = vmul.f32 %v1837_v49, %v1837_v49 }
 0x191   : > { %v686_v10 = vmul.f32 0.0078125, %v627_v8  ;;  %v747_v14 = vmul.f32 %v1834_v5, %v1834_v5 }
 0x192   : > { %815 = vadd.xlane.f32.xlu1 %v764_v46  ;;  %v1849_v17 = vsub.f32 %v1713_v59, %v685_v11 }
 0x193   : > { %v1844_v15 = vsub.f32 %v1708_v58, %v686_v10  ;;  %781 = vadd.xlane.f32.xlu0 %v747_v14  ;;  %v657_v16 = vpop.xlane.xlu0 %656 }
 0x194   : > { %v659_v54 = vpop.xlane.xlu1 %658  ;;  %v701_v38 = vmul.f32 0.0078125, %v657_v16  ;;  %v749_v33 = vmul.f32 %v1849_v17, %v1849_v17 }
 0x195   : > { %v702_v35 = vmul.f32 0.0078125, %v659_v54  ;;  %v750_v39 = vmul.f32 %v1844_v15, %v1844_v15 }
 0x196   : > { %v1857_v58 = vsub.f32 %v1721_v1, %v701_v38 }
 0x197   : > { %v1854_v40 = vsub.f32 %v1716_v0, %v702_v35  ;;  %787 = vadd.xlane.f32.xlu1 %v750_v39  ;;  %813 = vadd.xlane.f32.xlu0 %v763_v55  ;;  %v629_v45 = vpop.xlane.xlu0 %628 }
 0x198   : > { %v631_v44 = vpop.xlane.xlu1 %630  ;;  %v687_v50 = vmul.f32 0.0078125, %v629_v45  ;;  %v765_v1 = vmul.f32 %v1857_v58, %v1857_v58 }
 0x199   : > { %v688_v48 = vmul.f32 0.0078125, %v631_v44  ;;  %v766_v59 = vmul.f32 %v1854_v40, %v1854_v40 }
 0x19a   : > { %v1869_v56 = vsub.f32 %v1729_v7, %v687_v50 }
 0x19b   : > { %v1864_v53 = vsub.f32 %v1724_v6, %v688_v48  ;;  %819 = vadd.xlane.f32.xlu1 %v766_v59  ;;  %785 = vadd.xlane.f32.xlu0 %v749_v33  ;;  %v661_v36 = vpop.xlane.xlu0 %660 }
 0x19c   : > { %v663_v0 = vpop.xlane.xlu1 %662  ;;  %v703_v37 = vmul.f32 0.0078125, %v661_v36  ;;  %v751_v4 = vmul.f32 %v1869_v56, %v1869_v56 }
 0x19d   : > { %v704_v57 = vmul.f32 0.0078125, %v663_v0  ;;  %v752_v60 = vmul.f32 %v1864_v53, %v1864_v53 }
 0x19e   : > { %v1877_v6 = vsub.f32 %v1737_v13, %v703_v37 }
 0x19f   : > { %v1874_v42 = vsub.f32 %v1732_v12, %v704_v57  ;;  %791 = vadd.xlane.f32.xlu1 %v752_v60  ;;  %817 = vadd.xlane.f32.xlu0 %v765_v1  ;;  %v633_v43 = vpop.xlane.xlu0 %632 }
 0x1a0   : > { %v635_v62 = vpop.xlane.xlu1 %634  ;;  %v689_v3 = vmul.f32 0.0078125, %v633_v43  ;;  %v767_v13 = vmul.f32 %v1877_v6, %v1877_v6 }
 0x1a1   : > { %v690_v2 = vmul.f32 0.0078125, %v635_v62  ;;  %v768_v7 = vmul.f32 %v1874_v42, %v1874_v42 }
 0x1a2   : > { %v1889_v10 = vsub.f32 %v1745_v19, %v689_v3 }
 0x1a3   : > { %v1884_v8 = vsub.f32 %v1740_v18, %v690_v2  ;;  %823 = vadd.xlane.f32.xlu1 %v768_v7  ;;  %789 = vadd.xlane.f32.xlu0 %v751_v4  ;;  %v665_v9 = vpop.xlane.xlu0 %664 }
 0x1a4   : > { %v667_v12 = vpop.xlane.xlu1 %666  ;;  %v705_v46 = vmul.f32 0.0078125, %v665_v9  ;;  %v753_v39 = vmul.f32 %v1889_v10, %v1889_v10 }
 0x1a5   : > { %v706_v11 = vmul.f32 0.0078125, %v667_v12  ;;  %v754_v14 = vmul.f32 %v1884_v8, %v1884_v8 }
 0x1a6   : > { %v1897_v18 = vsub.f32 %v1753_v21, %v705_v46 }
 0x1a7   : > { %v1894_v54 = vsub.f32 %v1748_v20, %v706_v11  ;;  %795 = vadd.xlane.f32.xlu1 %v754_v14  ;;  %821 = vadd.xlane.f32.xlu0 %v767_v13  ;;  %v637_v55 = vpop.xlane.xlu0 %636 }
 0x1a8   : > { %v639_v16 = vpop.xlane.xlu1 %638  ;;  %v691_v38 = vmul.f32 0.0078125, %v637_v55  ;;  %v769_v21 = vmul.f32 %v1897_v18, %v1897_v18 }
 0x1a9   : > { %v692_v35 = vmul.f32 0.0078125, %v639_v16  ;;  %v770_v19 = vmul.f32 %v1894_v54, %v1894_v54 }
 0x1aa   : > { %v1909_v48 = vsub.f32 %v1761_v23, %v691_v38 }
 0x1ab   : > { %v1904_v44 = vsub.f32 %v1756_v22, %v692_v35  ;;  %827 = vadd.xlane.f32.xlu1 %v770_v19  ;;  %793 = vadd.xlane.f32.xlu0 %v753_v39  ;;  %v669_v45 = vpop.xlane.xlu0 %668 }
 0x1ac   : > { %v671_v20 = vpop.xlane.xlu1 %670  ;;  %v707_v59 = vmul.f32 0.0078125, %v669_v45  ;;  %v755_v60 = vmul.f32 %v1909_v48, %v1909_v48 }
 0x1ad   : > { %v708_v50 = vmul.f32 0.0078125, %v671_v20  ;;  %v756_v33 = vmul.f32 %v1904_v44, %v1904_v44 }
 0x1ae   : > { %v1917_v22 = vsub.f32 %v1769_v25, %v707_v59 }
 0x1af   : > { %v1914_v0 = vsub.f32 %v1764_v24, %v708_v50  ;;  %799 = vadd.xlane.f32.xlu1 %v756_v33  ;;  %825 = vadd.xlane.f32.xlu0 %v769_v21  ;;  %v641_v1 = vpop.xlane.xlu0 %640 }
 0x1b0   : > { %v643_v36 = vpop.xlane.xlu1 %642  ;;  %v693_v37 = vmul.f32 0.0078125, %v641_v1  ;;  %v771_v25 = vmul.f32 %v1917_v22, %v1917_v22 }
 0x1b1   : > { %v694_v57 = vmul.f32 0.0078125, %v643_v36  ;;  %v772_v23 = vmul.f32 %v1914_v0, %v1914_v0 }
 0x1b2   : > { %v1929_v2 = vsub.f32 %v1777_v27, %v693_v37 }
 0x1b3   : > { %v1924_v62 = vsub.f32 %v1772_v26, %v694_v57  ;;  %831 = vadd.xlane.f32.xlu1 %v772_v23  ;;  %797 = vadd.xlane.f32.xlu0 %v755_v60  ;;  %v673_v43 = vpop.xlane.xlu0 %672 }
 0x1b4   : > { %v675_v24 = vpop.xlane.xlu1 %674  ;;  %v709_v7 = vmul.f32 0.0078125, %v673_v43  ;;  %v757_v14 = vmul.f32 %v1929_v2, %v1929_v2 }
 0x1b5   : > { %v710_v3 = vmul.f32 0.0078125, %v675_v24  ;;  %v758_v4 = vmul.f32 %v1924_v62, %v1924_v62 }
 0x1b6   : > { %v1937_v26 = vsub.f32 %v1785_v29, %v709_v7 }
 0x1b7   : > { %v1934_v12 = vsub.f32 %v1780_v28, %v710_v3  ;;  %803 = vadd.xlane.f32.xlu1 %v758_v4  ;;  %829 = vadd.xlane.f32.xlu0 %v771_v25  ;;  %v645_v13 = vpop.xlane.xlu0 %644 }
 0x1b8   : > { %v647_v9 = vpop.xlane.xlu1 %646  ;;  %v695_v46 = vmul.f32 0.0078125, %v645_v13  ;;  %v773_v29 = vmul.f32 %v1937_v26, %v1937_v26 }
 0x1b9   : > { %v696_v11 = vmul.f32 0.0078125, %v647_v9  ;;  %v774_v27 = vmul.f32 %v1934_v12, %v1934_v12 }
 0x1ba   : > { %v1949_v35 = vsub.f32 %v1793_v31, %v695_v46  ;;  %v1969_v46 = vld [vmem:[%s2168_s3] ss:$0 sm:$0xff] }
 0x1bb   : > { %v1944_v16 = vsub.f32 %v1788_v30, %v696_v11  ;;  %835 = vadd.xlane.f32.xlu1 %v774_v27  ;;  %801 = vadd.xlane.f32.xlu0 %v757_v14  ;;  %v677_v55 = vpop.xlane.xlu0 %676 }
 0x1bc   : > { %v679_v28 = vpop.xlane.xlu1 %678  ;;  %v711_v19 = vmul.f32 0.0078125, %v677_v55  ;;  %v759_v31 = vmul.f32 %v1949_v35, %v1949_v35 }
 0x1bd   : > { %v712_v38 = vmul.f32 0.0078125, %v679_v28  ;;  %v760_v39 = vmul.f32 %v1944_v16, %v1944_v16 }
 0x1be   : > { %v1957_v30 = vsub.f32 %v1801_v34, %v711_v19 }
 0x1bf   : > { %v1954_v20 = vsub.f32 %v1796_v32, %v712_v38  ;;  %807 = vadd.xlane.f32.xlu1 %v760_v39  ;;  %833 = vadd.xlane.f32.xlu0 %v773_v29  ;;  %v1977_v38 = vld [vmem:[%s2169_s4] ss:$0 sm:$0xff] }
 0x1c0   : > { %v775_v21 = vmul.f32 %v1957_v30, %v1957_v30 }
 0x1c1   : > { %v776_v45 = vmul.f32 %v1954_v20, %v1954_v20 }
 0x1c3   : > { %839 = vadd.xlane.f32.xlu1 %v776_v45  ;;  %805 = vadd.xlane.f32.xlu0 %v759_v31 }
 0x1c7   : > { %837 = vadd.xlane.f32.xlu0 %v775_v21 }
 0x213   : > { %v780_v50 = vpop.xlane.xlu1 %779 }
 0x214   : > { %v842_v32 = vmul.f32 0.0078125, %v780_v50 }
 0x216   : > { %v874_v59 = vadd.f32 1e-05, %v842_v32 }
 0x217   : > { %v812_v33 = vpop.xlane.xlu1 %811  ;;  %v778_v36 = vpop.xlane.xlu0 %777 }
 0x218   : > { %1366 = vrsqrt.f32 %v874_v59  ;;  %v858_v34 = vmul.f32 0.0078125, %v812_v33  ;;  %v841_v1 = vmul.f32 0.0078125, %v778_v36 }
 0x21a   : > { %v890_v57 = vadd.f32 1e-05, %v858_v34  ;;  %v873_v37 = vadd.f32 1e-05, %v841_v1 }
 0x21b   : > { %v784_v23 = vpop.xlane.xlu1 %783  ;;  %v810_v60 = vpop.xlane.xlu0 %809 }
 0x21c   : > { %1368 = vrsqrt.f32 %v890_v57  ;;  %v844_v24 = vmul.f32 0.0078125, %v784_v23  ;;  %v857_v43 = vmul.f32 0.0078125, %v810_v60 }
 0x21d   : > { %1370 = vrsqrt.f32 %v873_v37 }
 0x21e   : > { %v876_v25 = vadd.f32 1e-05, %v844_v24  ;;  %v889_v3 = vadd.f32 1e-05, %v857_v43 }
 0x21f   : > { %v816_v7 = vpop.xlane.xlu1 %815 }
 0x220   : > { %v782_v4 = vpop.xlane.xlu0 %781  ;;  %1372 = vrsqrt.f32 %v876_v25  ;;  %v860_v9 = vmul.f32 0.0078125, %v816_v7 }
 0x221   : > { %v843_v13 = vmul.f32 0.0078125, %v782_v4  ;;  %1374 = vrsqrt.f32 %v889_v3 }
 0x222   : > { %v1367_v11 = vpop.eup %1366  ;;  %v892_v27 = vadd.f32 1e-05, %v860_v9 }
 0x223   : > { %v875_v14 = vadd.f32 1e-05, %v843_v13  ;;  %v938_v28 = vmul.f32 %v1367_v11, %v1806_v41 }
 0x224   : > { %v788_v55 = vpop.xlane.xlu1 %787  ;;  %v814_v29 = vpop.xlane.xlu0 %813  ;;  %1376 = vrsqrt.f32 %v892_v27 }
 0x225   : > { %v846_v19 = vmul.f32 0.0078125, %v788_v55  ;;  %v859_v39 = vmul.f32 0.0078125, %v814_v29  ;;  %v977_v45 = vmul.f32 %v1969_v46, %v938_v28  ;;  %1378 = vrsqrt.f32 %v875_v14 }
 0x226   : > { %v1369_v31 = vpop.eup %1368 }
 0x227   : > { %v878_v21 = vadd.f32 1e-05, %v846_v19  ;;  %v891_v50 = vadd.f32 1e-05, %v859_v39  ;;  %v1371_v32 = vpop.eup %1370  ;;  %v1016_v59 = vadd.f32 %v1977_v38, %v977_v45  ;;  %v954_v41 = vmul.f32 %v1369_v31, %v1809_v47 }
 0x228   : > { %v820_v33 = vpop.xlane.xlu1 %819  ;;  %v786_v36 = vpop.xlane.xlu0 %785  ;;  %v937_v34 = vmul.f32 %v1371_v32, %v1814_v51 }
 0x229   : > { %1380 = vrsqrt.f32 %v878_v21  ;;  %v862_v1 = vmul.f32 0.0078125, %v820_v33  ;;  %v845_v57 = vmul.f32 0.0078125, %v786_v36  ;;  %1048 = vst [vmem:[%s1983_s7 + $0x8] sm:$0xff] %v1016_v59  ;;  %v993_v37 = vmul.f32 %v1969_v46, %v954_v41 }
 0x22a   : > { %1382 = vrsqrt.f32 %v891_v50  ;;  %v1373_v23 = vpop.eup %1372  ;;  %v976_v60 = vmul.f32 %v1969_v46, %v937_v34 }
 0x22b   : > { %v894_v24 = vadd.f32 1e-05, %v862_v1  ;;  %v877_v47 = vadd.f32 1e-05, %v845_v57  ;;  %v1375_v43 = vpop.eup %1374  ;;  %v1032_v51 = vadd.f32 %v1977_v38, %v993_v37  ;;  %v940_v25 = vmul.f32 %v1373_v23, %v1817_v52 }
 0x22c   : > { %v792_v3 = vpop.xlane.xlu1 %791  ;;  %v818_v7 = vpop.xlane.xlu0 %817  ;;  %v1015_v4 = vadd.f32 %v1977_v38, %v976_v60  ;;  %v953_v9 = vmul.f32 %v1375_v43, %v1824_v61 }
 0x22d   : > { %1384 = vrsqrt.f32 %v894_v24  ;;  %v848_v13 = vmul.f32 0.0078125, %v792_v3  ;;  %1064 = vst [vmem:[%s1983_s7 + $0x88] sm:$0xff] %v1032_v51  ;;  %v979_v11 = vmul.f32 %v1969_v46, %v940_v25  ;;  %v861_v27 = vmul.f32 0.0078125, %v818_v7 }
 0x22e   : > { %1386 = vrsqrt.f32 %v877_v47  ;;  %v1377_v14 = vpop.eup %1376  ;;  %1047 = vst [vmem:[%s1983_s7] sm:$0xff] %v1015_v4  ;;  %v992_v28 = vmul.f32 %v1969_v46, %v953_v9 }
 0x22f   : > { %v880_v55 = vadd.f32 1e-05, %v848_v13  ;;  %v1379_v52 = vpop.eup %1378  ;;  %v1018_v29 = vadd.f32 %v1977_v38, %v979_v11  ;;  %v956_v19 = vmul.f32 %v1377_v14, %v1829_v63  ;;  %v893_v61 = vadd.f32 1e-05, %v861_v27 }
 0x230   : > { %v824_v39 = vpop.xlane.xlu1 %823  ;;  %v790_v45 = vpop.xlane.xlu0 %789  ;;  %v1031_v31 = vadd.f32 %v1977_v38, %v992_v28  ;;  %v939_v21 = vmul.f32 %v1379_v52, %v1834_v5 }
 0x231   : > { %1388 = vrsqrt.f32 %v880_v55  ;;  %v864_v50 = vmul.f32 0.0078125, %v824_v39  ;;  %1050 = vst [vmem:[%s1983_s7 + $0x18] sm:$0xff] %v1018_v29  ;;  %v995_v32 = vmul.f32 %v1969_v46, %v956_v19  ;;  %v847_v59 = vmul.f32 0.0078125, %v790_v45 }
 0x232   : > { %1390 = vrsqrt.f32 %v893_v61  ;;  %1063 = vst [vmem:[%s1983_s7 + $0x80] sm:$0xff] %v1031_v31  ;;  %v978_v33 = vmul.f32 %v1969_v46, %v939_v21 }
 0x233   : > { %v1381_v41 = vpop.eup %1380  ;;  %v896_v63 = vadd.f32 1e-05, %v864_v50  ;;  %v1034_v34 = vadd.f32 %v1977_v38, %v995_v32  ;;  %v879_v5 = vadd.f32 1e-05, %v847_v59 }
 0x234   : > { %v1383_v36 = vpop.eup %1382  ;;  %v942_v1 = vmul.f32 %v1381_v41, %v1844_v15  ;;  %v796_v57 = vpop.xlane.xlu1 %795  ;;  %v1017_v23 = vadd.f32 %v1977_v38, %v978_v33 }
 0x235   : > { %v822_v37 = vpop.xlane.xlu0 %821  ;;  %v955_v60 = vmul.f32 %v1383_v36, %v1837_v49  ;;  %1392 = vrsqrt.f32 %v896_v63  ;;  %v850_v24 = vmul.f32 0.0078125, %v796_v57  ;;  %1066 = vst [vmem:[%s1983_s7 + $0x98] sm:$0xff] %v1034_v34 }
 0x236   : > { %v981_v47 = vmul.f32 %v1969_v46, %v942_v1  ;;  %1394 = vrsqrt.f32 %v879_v5  ;;  %v863_v43 = vmul.f32 0.0078125, %v822_v37  ;;  %1049 = vst [vmem:[%s1983_s7 + $0x10] sm:$0xff] %v1017_v23 }
 0x237   : > { %v1385_v51 = vpop.eup %1384  ;;  %v994_v25 = vmul.f32 %v1969_v46, %v955_v60  ;;  %v882_v15 = vadd.f32 1e-05, %v850_v24 }
 0x238   : > { %v1387_v3 = vpop.eup %1386  ;;  %v1020_v7 = vadd.f32 %v1977_v38, %v981_v47  ;;  %v958_v4 = vmul.f32 %v1385_v51, %v1854_v40  ;;  %v895_v49 = vadd.f32 1e-05, %v863_v43  ;;  %v828_v9 = vpop.xlane.xlu1 %827 }
 0x239   : > { %v794_v13 = vpop.xlane.xlu0 %793  ;;  %v1033_v11 = vadd.f32 %v1977_v38, %v994_v25  ;;  %v941_v27 = vmul.f32 %v1387_v3, %v1849_v17  ;;  %1396 = vrsqrt.f32 %v882_v15  ;;  %v866_v14 = vmul.f32 0.0078125, %v828_v9 }
 0x23a   : > { %1052 = vst [vmem:[%s1983_s7 + $0x28] sm:$0xff] %v1020_v7  ;;  %v997_v28 = vmul.f32 %v1969_v46, %v958_v4  ;;  %1398 = vrsqrt.f32 %v895_v49  ;;  %v849_v55 = vmul.f32 0.0078125, %v794_v13 }
 0x23b   : > { %v1389_v52 = vpop.eup %1388  ;;  %1065 = vst [vmem:[%s1983_s7 + $0x90] sm:$0xff] %v1033_v11  ;;  %v980_v29 = vmul.f32 %v1969_v46, %v941_v27  ;;  %v898_v40 = vadd.f32 1e-05, %v866_v14 }
 0x23c   : > { %v1391_v19 = vpop.eup %1390  ;;  %v1036_v61 = vadd.f32 %v1977_v38, %v997_v28  ;;  %v944_v39 = vmul.f32 %v1389_v52, %v1864_v53  ;;  %v881_v17 = vadd.f32 1e-05, %v849_v55  ;;  %v800_v45 = vpop.xlane.xlu1 %799 }
 0x23d   : > { %v826_v31 = vpop.xlane.xlu0 %825  ;;  %v1019_v21 = vadd.f32 %v1977_v38, %v980_v29  ;;  %v957_v50 = vmul.f32 %v1391_v19, %v1857_v58  ;;  %1400 = vrsqrt.f32 %v898_v40  ;;  %v852_v32 = vmul.f32 0.0078125, %v800_v45 }
 0x23e   : > { %1068 = vst [vmem:[%s1983_s7 + $0xa8] sm:$0xff] %v1036_v61  ;;  %v983_v59 = vmul.f32 %v1969_v46, %v944_v39  ;;  %1402 = vrsqrt.f32 %v881_v17  ;;  %v865_v41 = vmul.f32 0.0078125, %v826_v31 }
 0x23f   : > { %v1393_v33 = vpop.eup %1392  ;;  %1051 = vst [vmem:[%s1983_s7 + $0x20] sm:$0xff] %v1019_v21  ;;  %v996_v63 = vmul.f32 %v1969_v46, %v957_v50  ;;  %v884_v53 = vadd.f32 1e-05, %v852_v32 }
 0x240   : > { %v1395_v36 = vpop.eup %1394  ;;  %v1022_v34 = vadd.f32 %v1977_v38, %v983_v59  ;;  %v960_v1 = vmul.f32 %v1393_v33, %v1874_v42  ;;  %v897_v58 = vadd.f32 1e-05, %v865_v41  ;;  %v832_v5 = vpop.xlane.xlu1 %831 }
 0x241   : > { %v798_v57 = vpop.xlane.xlu0 %797  ;;  %v1035_v37 = vadd.f32 %v1977_v38, %v996_v63  ;;  %v943_v23 = vmul.f32 %v1395_v36, %v1869_v56  ;;  %1404 = vrsqrt.f32 %v884_v53  ;;  %v868_v60 = vmul.f32 0.0078125, %v832_v5 }
 0x242   : > { %1054 = vst [vmem:[%s1983_s7 + $0x38] sm:$0xff] %v1022_v34  ;;  %v999_v24 = vmul.f32 %v1969_v46, %v960_v1  ;;  %1406 = vrsqrt.f32 %v897_v58  ;;  %v851_v47 = vmul.f32 0.0078125, %v798_v57 }
 0x243   : > { %v1397_v43 = vpop.eup %1396  ;;  %1067 = vst [vmem:[%s1983_s7 + $0xa0] sm:$0xff] %v1035_v37  ;;  %v982_v51 = vmul.f32 %v1969_v46, %v943_v23  ;;  %v900_v42 = vadd.f32 1e-05, %v868_v60 }
 0x244   : > { %v1399_v25 = vpop.eup %1398  ;;  %v1038_v15 = vadd.f32 %v1977_v38, %v999_v24  ;;  %v946_v3 = vmul.f32 %v1397_v43, %v1884_v8  ;;  %v883_v56 = vadd.f32 1e-05, %v851_v47  ;;  %v804_v7 = vpop.xlane.xlu1 %803 }
 0x245   : > { %v830_v4 = vpop.xlane.xlu0 %829  ;;  %v1021_v49 = vadd.f32 %v1977_v38, %v982_v51  ;;  %v959_v9 = vmul.f32 %v1399_v25, %v1877_v6  ;;  %1408 = vrsqrt.f32 %v900_v42  ;;  %v854_v13 = vmul.f32 0.0078125, %v804_v7 }
 0x246   : > { %1070 = vst [vmem:[%s1983_s7 + $0xb8] sm:$0xff] %v1038_v15  ;;  %v985_v11 = vmul.f32 %v1969_v46, %v946_v3  ;;  %1410 = vrsqrt.f32 %v883_v56  ;;  %v867_v27 = vmul.f32 0.0078125, %v830_v4 }
 0x247   : > { %v1401_v14 = vpop.eup %1400  ;;  %1053 = vst [vmem:[%s1983_s7 + $0x30] sm:$0xff] %v1021_v49  ;;  %v998_v28 = vmul.f32 %v1969_v46, %v959_v9  ;;  %v886_v8 = vadd.f32 1e-05, %v854_v13 }
 0x248   : > { %v1403_v55 = vpop.eup %1402  ;;  %v1024_v52 = vadd.f32 %v1977_v38, %v985_v11  ;;  %v962_v29 = vmul.f32 %v1401_v14, %v1894_v54  ;;  %v899_v6 = vadd.f32 1e-05, %v867_v27  ;;  %v836_v40 = vpop.xlane.xlu1 %835 }
 0x249   : > { %v802_v19 = vpop.xlane.xlu0 %801  ;;  %v1037_v61 = vadd.f32 %v1977_v38, %v998_v28  ;;  %v945_v39 = vmul.f32 %v1403_v55, %v1889_v10  ;;  %1412 = vrsqrt.f32 %v886_v8  ;;  %v870_v17 = vmul.f32 0.0078125, %v836_v40 }
 0x24a   : > { %1056 = vst [vmem:[%s1983_s7 + $0x48] sm:$0xff] %v1024_v52  ;;  %v1001_v45 = vmul.f32 %v1969_v46, %v962_v29  ;;  %1414 = vrsqrt.f32 %v899_v6  ;;  %v853_v31 = vmul.f32 0.0078125, %v802_v19 }
 0x24b   : > { %v1405_v21 = vpop.eup %1404  ;;  %1069 = vst [vmem:[%s1983_s7 + $0xb0] sm:$0xff] %v1037_v61  ;;  %v984_v50 = vmul.f32 %v1969_v46, %v945_v39  ;;  %v902_v54 = vadd.f32 1e-05, %v870_v17 }
 0x24c   : > { %v1407_v32 = vpop.eup %1406  ;;  %v1040_v59 = vadd.f32 %v1977_v38, %v1001_v45  ;;  %v948_v41 = vmul.f32 %v1405_v21, %v1904_v44  ;;  %v885_v10 = vadd.f32 1e-05, %v853_v31  ;;  %v808_v33 = vpop.xlane.xlu1 %807 }
 0x24d   : > { %v834_v63 = vpop.xlane.xlu0 %833  ;;  %v1023_v53 = vadd.f32 %v1977_v38, %v984_v50  ;;  %v961_v36 = vmul.f32 %v1407_v32, %v1897_v18  ;;  %1416 = vrsqrt.f32 %v902_v54  ;;  %v856_v34 = vmul.f32 0.0078125, %v808_v33 }
 0x24e   : > { %1072 = vst [vmem:[%s1983_s7 + $0xc8] sm:$0xff] %v1040_v59  ;;  %v987_v1 = vmul.f32 %v1969_v46, %v948_v41  ;;  %1418 = vrsqrt.f32 %v885_v10  ;;  %v869_v58 = vmul.f32 0.0078125, %v834_v63 }
 0x24f   : > { %v1409_v5 = vpop.eup %1408  ;;  %1055 = vst [vmem:[%s1983_s7 + $0x40] sm:$0xff] %v1023_v53  ;;  %v1000_v57 = vmul.f32 %v1969_v46, %v961_v36  ;;  %v888_v44 = vadd.f32 1e-05, %v856_v34 }
 0x250   : > { %v1411_v37 = vpop.eup %1410  ;;  %v1026_v23 = vadd.f32 %v1977_v38, %v987_v1  ;;  %v964_v60 = vmul.f32 %v1409_v5, %v1914_v0  ;;  %v901_v18 = vadd.f32 1e-05, %v869_v58  ;;  %v840_v24 = vpop.xlane.xlu1 %839 }
 0x251   : > { %v806_v47 = vpop.xlane.xlu0 %805  ;;  %v1039_v43 = vadd.f32 %v1977_v38, %v1000_v57  ;;  %v947_v51 = vmul.f32 %v1411_v37, %v1909_v48  ;;  %1420 = vrsqrt.f32 %v888_v44  ;;  %v872_v42 = vmul.f32 0.0078125, %v840_v24 }
 0x252   : > { %1058 = vst [vmem:[%s1983_s7 + $0x58] sm:$0xff] %v1026_v23  ;;  %v1003_v25 = vmul.f32 %v1969_v46, %v964_v60  ;;  %1422 = vrsqrt.f32 %v901_v18  ;;  %v855_v15 = vmul.f32 0.0078125, %v806_v47 }
 0x253   : > { %v1413_v3 = vpop.eup %1412  ;;  %1071 = vst [vmem:[%s1983_s7 + $0xc0] sm:$0xff] %v1039_v43  ;;  %v986_v0 = vmul.f32 %v1969_v46, %v947_v51  ;;  %v904_v56 = vadd.f32 1e-05, %v872_v42 }
 0x254   : > { %v1415_v7 = vpop.eup %1414  ;;  %v1042_v4 = vadd.f32 %v1977_v38, %v1003_v25  ;;  %v950_v49 = vmul.f32 %v1413_v3, %v1924_v62  ;;  %v887_v48 = vadd.f32 1e-05, %v855_v15 }
 0x255   : > { %v838_v9 = vpop.xlane.xlu0 %837  ;;  %v1025_v13 = vadd.f32 %v1977_v38, %v986_v0  ;;  %v963_v11 = vmul.f32 %v1415_v7, %v1917_v22  ;;  %1424 = vrsqrt.f32 %v904_v56 }
 0x256   : > { %v871_v27 = vmul.f32 0.0078125, %v838_v9  ;;  %1074 = vst [vmem:[%s1983_s7 + $0xd8] sm:$0xff] %v1042_v4  ;;  %v989_v14 = vmul.f32 %v1969_v46, %v950_v49  ;;  %1426 = vrsqrt.f32 %v887_v48 }
 0x257   : > { %v1417_v28 = vpop.eup %1416  ;;  %1057 = vst [vmem:[%s1983_s7 + $0x50] sm:$0xff] %v1025_v13  ;;  %v1002_v8 = vmul.f32 %v1969_v46, %v963_v11 }
 0x258   : > { %v903_v55 = vadd.f32 1e-05, %v871_v27  ;;  %v1419_v62 = vpop.eup %1418  ;;  %v1028_v52 = vadd.f32 %v1977_v38, %v989_v14  ;;  %v966_v29 = vmul.f32 %v1417_v28, %v1934_v12 }
 0x259   : > { %v1041_v22 = vadd.f32 %v1977_v38, %v1002_v8  ;;  %v949_v6 = vmul.f32 %v1419_v62, %v1929_v2 }
 0x25a   : > { %1428 = vrsqrt.f32 %v903_v55  ;;  %1060 = vst [vmem:[%s1983_s7 + $0x68] sm:$0xff] %v1028_v52  ;;  %v1005_v40 = vmul.f32 %v1969_v46, %v966_v29 }
 0x25b   : > { %v1421_v19 = vpop.eup %1420  ;;  %1073 = vst [vmem:[%s1983_s7 + $0xd0] sm:$0xff] %v1041_v22  ;;  %v988_v61 = vmul.f32 %v1969_v46, %v949_v6 }
 0x25c   : > { %v1423_v39 = vpop.eup %1422  ;;  %v1044_v17 = vadd.f32 %v1977_v38, %v1005_v40  ;;  %v952_v45 = vmul.f32 %v1421_v19, %v1944_v16 }
 0x25d   : > { %v1027_v12 = vadd.f32 %v1977_v38, %v988_v61  ;;  %v965_v31 = vmul.f32 %v1423_v39, %v1937_v26 }
 0x25e   : > { %1076 = vst [vmem:[%s1983_s7 + $0xe8] sm:$0xff] %v1044_v17  ;;  %v991_v2 = vmul.f32 %v1969_v46, %v952_v45 }
 0x25f   : > { %v1425_v21 = vpop.eup %1424  ;;  %1059 = vst [vmem:[%s1983_s7 + $0x60] sm:$0xff] %v1027_v12  ;;  %v1004_v50 = vmul.f32 %v1969_v46, %v965_v31 }
 0x260   : > { %v1427_v54 = vpop.eup %1426  ;;  %v1030_v32 = vadd.f32 %v1977_v38, %v991_v2  ;;  %v968_v16 = vmul.f32 %v1425_v21, %v1954_v20 }
 0x261   : > { %v1043_v59 = vadd.f32 %v1977_v38, %v1004_v50  ;;  %v951_v26 = vmul.f32 %v1427_v54, %v1949_v35 }
 0x262   : > { %1062 = vst [vmem:[%s1983_s7 + $0x78] sm:$0xff] %v1030_v32  ;;  %v1007_v41 = vmul.f32 %v1969_v46, %v968_v16 }
 0x263   : > { %1075 = vst [vmem:[%s1983_s7 + $0xe0] sm:$0xff] %v1043_v59  ;;  %v990_v33 = vmul.f32 %v1969_v46, %v951_v26 }
 0x264   : > { %v1429_v10 = vpop.eup %1428  ;;  %v1046_v63 = vadd.f32 %v1977_v38, %v1007_v41 }
 0x265   : > { %v967_v53 = vmul.f32 %v1429_v10, %v1957_v30  ;;  %v1029_v20 = vadd.f32 %v1977_v38, %v990_v33 }
 0x266   : > { %1078 = vst [vmem:[%s1983_s7 + $0xf8] sm:$0xff] %v1046_v63 }
 0x267   : > { %v1006_v35 = vmul.f32 %v1969_v46, %v967_v53  ;;  %1061 = vst [vmem:[%s1983_s7 + $0x70] sm:$0xff] %v1029_v20 }
 0x269   : > { %v1045_v30 = vadd.f32 %v1977_v38, %v1006_v35 }
 0x26b   : > { %1077 = vst [vmem:[%s1983_s7 + $0xf0] sm:$0xff] %v1045_v30 }
 0x26c   : > { %1443 = shalt.err (!%p1440_p5)
}
 0x26d   : > { %s1444_s16 = scalar_lea.hbm %s2111_s12, 4096  ;;  %s1448_s27 = scalar_lea.hbm %s2170_s5, 8192 }
 0x26e   : > { %p1445_p6 = scmp.ne.s32.totalorder %s2111_s12, %s1444_s16  ;;  %p1449_p10 = scmp.lt.u32.totalorder %s2111_s12, %s2170_s5 }
 0x26f   : > { %p1450_p11 = scmp.lt.u32.totalorder %s1448_s27, %s1444_s16  ;;  %p1452_p13 = scmp.lt.u32.totalorder %s1444_s16, %s2111_s12 }
 0x270   : > { %p1446_p7 = pnand %p1445_p6, %p1583_p4 }
 0x271   : > { %p1451_p12 = por %p1450_p11, %p1449_p10 }
 0x272   : > { %p1447_p9 = pneg %p1446_p7 }
 0x273   : > { %p1453_p0 = por %p1452_p13, %p1451_p12 }
 0x275   : > { %p1454_p1 = pnand %p1453_p0, %p1447_p9 }
 0x277   : > { %1457 = shalt.err (!%p1454_p1)
}
 0x278   : > { %s1511_s8 = smov 128   ;;  %s1512_s10 = smov 8  }
 0x279   : > { %1309 = dma.vmem_to_hbm [thread:$0]  (%p1583_p4), %s2113_s9, 4096, %s2111_s12, %s2119_s21, %s1511_s8, %s1511_s8, %s1512_s10  }
 0x27a PF: > { %p1315_p2 = scmp.ge.s32.totalorder %s1508_s23, 2  ;;  %s1110_s11 = sand.u32 1, %s1488_s18  }
 0x27b   : > { %s1111_s13 = scalar_lea.sflag [#allocation3], %s1110_s11 }
 0x27c   : > { %p1312_p3 = pnand %p1315_p2, %p1590_p8 }
 0x27e   : > { %1483 = dma.done.wait (!%p1312_p3), %s1111_s13, 4096  }
 0x27f   : > { %1485 = vsyncadd (!%p1312_p3), %s1111_s13, 4294963200  ;;  %s18_s23 = sadd.s32 1, %s1508_s23   ;;  %s2173_s18 = smov %s1492_s19 }
 0x280   : > { %p15_p5 = scmp.ge.s32.totalorder %s18_s23, 4   ;;  %s2174_s19 = smov %s1496_s20 }
 0x281   : > { %s2175_s20 = smov %s1596_s6  ;;  %s2176_s21 = smov %s1504_s22 }
 0x282   : > { %s2177_s22 = smov %s2179_s26  ;;  %17 = sbr.rel (!%p15_p5) target bundleno = 4 (0x4), region = 75 }
 0x289   :  { %1116 = vsyncpa [#allocation3], 1 }
 0x28a   :  { %1118 = vsyncpa [#allocation3 + $0x1], 1 }

</bundles_post_ra>
